<compile_context>
chip_gen: v7x
topology: tpu7x:2x2x1
jax: 0.10.0
libtpu: 0.0.40
codegen_flags: <defaults>
</compile_context>

<pallas_src>
import functools

import jax
import jax.numpy as jnp
from jax.experimental import pallas as pl
from jax.experimental.pallas import tpu as pltpu


def _round_up(x, m):
    return (x + m - 1) // m * m


def _tpu_vmem_capacity_bytes():
    """Physical VMEM per TensorCore; falls back to the smallest gen (v7x, 64 MiB)."""
    try:
        info = pltpu.get_tpu_info()
        cap = getattr(info, "vmem_capacity_bytes", None)
        if cap:
            return int(cap)
    except Exception:
        pass
    return 64 << 20


# --------------------------------------------------------------------------
# Path A: fused, slab-resident kernel (one HBM read + one HBM write of x).
# --------------------------------------------------------------------------
def _ca_fused_kernel(x_ref, w1_ref, b1_ref, w2_ref, b2_ref, o_ref, *, inv_hw):
    # x_ref block: (1, C, HW); keep native dtype (no whole-slab f32 copy).
    x = x_ref[0]                                                          # (C, HW)

    # Global average pool: f32 accumulation over lanes, multiply by 1/HW.
    pooled = jnp.sum(x, axis=1, keepdims=True, dtype=jnp.float32) * inv_hw  # (C, 1)

    # Squeeze-excite MLP (tiny: this path is only taken for small slabs).
    z1 = jnp.dot(w1_ref[...], pooled, preferred_element_type=jnp.float32) + b1_ref[...]
    z1 = jnp.maximum(z1, 0.0)                                             # (Cr, 1)
    z2 = jnp.dot(w2_ref[...], z1, preferred_element_type=jnp.float32) + b2_ref[...]
    scale = jax.nn.sigmoid(z2)                                            # (C, 1) f32

    # Cast the scale (not the slab): matches the PyTorch module's single-dtype
    # multiply and avoids materializing a whole-slab f32 temporary in VMEM.
    o_ref[0] = x * scale.astype(x.dtype)


# --------------------------------------------------------------------------
# Path B: two-pass tiled kernels on a (B*C, H*W) view.
# --------------------------------------------------------------------------
def _pool_sum_kernel(x_ref, sum_ref, *, hw, thw, mask_tail):
    # Grid = (n_row_tiles, n_lane_tiles); lane axis is the reduction ("arbitrary").
    t = pl.program_id(1)

    @pl.when(t == 0)
    def _():
        sum_ref[...] = jnp.zeros_like(sum_ref)

    x = x_ref[...]                                                        # (TR, THW)
    if mask_tail:
        # Tail lane tile: the padded region of an edge block is unspecified, so it
        # must be masked out of the reduction (VPU select, hidden under the DMA).
        lane = jax.lax.broadcasted_iota(jnp.int32, x.shape, 1)
        x = jnp.where(lane < (hw - t * thw), x, jnp.zeros_like(x))

    # f32 accumulation of the lane (spatial) reduction.
    sum_ref[...] += jnp.sum(x, axis=1, keepdims=True, dtype=jnp.float32)


def _scale_kernel(x_ref, s_ref, o_ref):
    # x_ref block: (TR, THW); s_ref block: (TR, 1) f32 -> f32 multiply, cast product.
    # Edge blocks (rows beyond B*C, lanes beyond HW) are bounded by Pallas on write.
    o_ref[...] = (x_ref[...] * s_ref[...]).astype(o_ref.dtype)


# --------------------------------------------------------------------------
# Wrapper.
# --------------------------------------------------------------------------
_DEFAULT_BLOCK_BYTES = 4 << 20  # Path-B per-block target (>= ~2 MiB -> ~85%+ roofline)


def ca_layer(x_nchw, w1, b1, w2, b2, *,
             fused_slab_bytes_max=None,
             block_bytes_target=_DEFAULT_BLOCK_BYTES):
    """Channel attention forward.

    Args:
      x_nchw: (B, C, H, W) input.
      w1: (C//r, C) weight of first 1x1 conv, b1: (C//r,)
      w2: (C, C//r) weight of second 1x1 conv, b2: (C,)
    Returns:
      (B, C, H, W) output, same dtype as input.
    """
    B, C, H, W = x_nchw.shape
    Cr = w1.shape[0]
    HW = H * W
    itemsize = x_nchw.dtype.itemsize
    slab_bytes = C * HW * itemsize

    # Generation-aware budgets.
    vmem_phys = _tpu_vmem_capacity_bytes()
    small_vmem = vmem_phys <= (64 << 20)             # v7x-like: 64 MiB VMEM, 2 TC/chip
    vmem_cap = (48 << 20) if small_vmem else (100 << 20)
    if fused_slab_bytes_max is None:
        fused_slab_bytes_max = (10 << 20) if small_vmem else (16 << 20)

    use_fused = slab_bytes <= fused_slab_bytes_max
    # On 2-TensorCore chips a grid of (B,) with B < 2 leaves a core idle; prefer the
    # tile-parallel two-pass path once the tensor is big enough for it to matter.
    if small_vmem and B < 2 and slab_bytes > (1 << 20):
        use_fused = False

    if use_fused:
        # ---------------- fused single-read path ----------------
        x = x_nchw.reshape(B, C, HW)
        w1_f = w1.astype(jnp.float32)
        w2_f = w2.astype(jnp.float32)
        b1_2d = b1.reshape(Cr, 1).astype(jnp.float32)
        b2_2d = b2.reshape(C, 1).astype(jnp.float32)

        # double-buffered in + out ~= 4x slab, plus weights/headroom; clamp per gen.
        vmem_limit = int(min(vmem_cap, max(16 << 20, 4 * slab_bytes + (4 << 20))))

        out = pl.pallas_call(
            functools.partial(_ca_fused_kernel, inv_hw=float(1.0 / HW)),
            out_shape=jax.ShapeDtypeStruct((B, C, HW), x_nchw.dtype),
            grid=(B,),
            in_specs=[
                pl.BlockSpec((1, C, HW), lambda b: (b, 0, 0)),   # x slab per batch
                pl.BlockSpec((Cr, C), lambda b: (0, 0)),         # W1
                pl.BlockSpec((Cr, 1), lambda b: (0, 0)),         # b1
                pl.BlockSpec((C, Cr), lambda b: (0, 0)),         # W2
                pl.BlockSpec((C, 1), lambda b: (0, 0)),          # b2
            ],
            out_specs=pl.BlockSpec((1, C, HW), lambda b: (b, 0, 0)),
            compiler_params=pltpu.CompilerParams(
                dimension_semantics=("parallel",),
                vmem_limit_bytes=vmem_limit),
        )(x, w1_f, b1_2d, w2_f, b2_2d)
        return out.reshape(B, C, H, W)

    # ---------------- two-pass tiled path ----------------
    # Flatten to (B*C, HW): dense sublanes even for tiny C, B folded into the
    # parallel row axis, and C never forces an oversized block.
    BC = B * C
    x2 = x_nchw.reshape(BC, HW)

    # Lane tile: multiple of 128 (or the full HW when HW < 128), lane-dense and
    # bounded so even a minimal 8-row block stays within the per-block byte budget.
    lane_cap = max(128, (block_bytes_target // (8 * itemsize)) // 128 * 128)
    if HW < 128:
        THW = HW
    elif HW % 128 == 0:
        THW = min(HW, lane_cap)
    else:
        THW = min((HW // 128) * 128, lane_cap)
    n_lane = pl.cdiv(HW, THW)
    mask_tail = (HW % THW) != 0

    # Row tile: multiple of the sublane packing, sized to the byte budget.
    row_align = 32 // itemsize                      # 8 (f32) / 16 (bf16) / 32 (int8)
    rows_fit = max(row_align, block_bytes_target // (THW * itemsize))
    if BC <= rows_fit:
        TR = BC                                     # full row extent: always legal
    else:
        TR = max(row_align, (rows_fit // row_align) * row_align)
    n_row = pl.cdiv(BC, TR)

    block_bytes = TR * THW * itemsize
    vmem_limit = int(min(vmem_cap, max(16 << 20, 6 * block_bytes + (2 << 20))))

    # Pass 1: tiled spatial reduction -> per-(batch*channel) f32 sums.
    sums = pl.pallas_call(
        functools.partial(_pool_sum_kernel, hw=HW, thw=THW, mask_tail=mask_tail),
        out_shape=jax.ShapeDtypeStruct((BC, 1), jnp.float32),
        grid=(n_row, n_lane),
        in_specs=[pl.BlockSpec((TR, THW), lambda r, t: (r, t))],
        out_specs=pl.BlockSpec((TR, 1), lambda r, t: (r, 0)),
        compiler_params=pltpu.CompilerParams(
            dimension_semantics=("parallel", "arbitrary"),
            vmem_limit_bytes=vmem_limit),
    )(x2)

    # Squeeze-excite MLP hoisted out of the kernel: one small batched GEMM each.
    mean = (sums[:, 0] * (1.0 / HW)).reshape(B, C)                        # (B, C) f32
    z = jnp.maximum(mean @ w1.astype(jnp.float32).T + b1.astype(jnp.float32), 0.0)
    scale = jax.nn.sigmoid(z @ w2.astype(jnp.float32).T + b2.astype(jnp.float32))
    scale2 = scale.reshape(BC, 1)                                         # (BC, 1) f32

    # Pass 2: tiled broadcast multiply (both grid axes independent -> "parallel").
    out = pl.pallas_call(
        _scale_kernel,
        out_shape=jax.ShapeDtypeStruct((BC, HW), x_nchw.dtype),
        grid=(n_row, n_lane),
        in_specs=[
            pl.BlockSpec((TR, THW), lambda r, t: (r, t)),
            pl.BlockSpec((TR, 1), lambda r, t: (r, 0)),
        ],
        out_specs=pl.BlockSpec((TR, THW), lambda r, t: (r, t)),
        compiler_params=pltpu.CompilerParams(
            dimension_semantics=("parallel", "parallel"),
            vmem_limit_bytes=vmem_limit),
    )(x2, scale2)

    return out.reshape(B, C, H, W)


def _ca_reference(x, w1, b1, w2, b2):
    # Pure-JAX reference mirroring the PyTorch module.
    y = jnp.mean(x, axis=(2, 3), keepdims=True)                          # (B,C,1,1)
    y = jnp.einsum("oc,bcxy->boxy", w1, y) + b1[None, :, None, None]
    y = jnp.maximum(y, 0.0)
    y = jnp.einsum("oc,bcxy->boxy", w2, y) + b2[None, :, None, None]
    y = jax.nn.sigmoid(y)
    return x * y


if __name__ == "__main__":
    key = jax.random.PRNGKey(0)
    kx, k1, k2, k3, k4, kx2, kx3 = jax.random.split(key, 7)
    reduction = 4

    def make_params(kc1, kc2, kc3, kc4, C):
        Cr = max(1, C // reduction)
        w1 = 0.3 * jax.random.normal(kc1, (Cr, C), dtype=jnp.float32)
        b1 = 0.1 * jax.random.normal(kc2, (Cr,), dtype=jnp.float32)
        w2 = 0.3 * jax.random.normal(kc3, (C, Cr), dtype=jnp.float32)
        b2 = 0.1 * jax.random.normal(kc4, (C,), dtype=jnp.float32)
        return w1, b1, w2, b2

    # Case 1: small shapes (module defaults) -> fused slab-resident path.
    B, C, H, W = 2, 4, 16, 16
    x = jax.random.normal(kx, (B, C, H, W), dtype=jnp.float32)
    w1, b1, w2, b2 = make_params(k1, k2, k3, k4, C)
    ref = _ca_reference(x, w1, b1, w2, b2)
    out_fused = jax.block_until_ready(ca_layer(x, w1, b1, w2, b2))
    assert out_fused.shape == (B, C, H, W)
    assert jnp.allclose(out_fused, ref, atol=1e-5, rtol=1e-5), "fused path mismatch"

    # Case 2: same inputs, force the two-pass tiled path (single tile, no mask).
    out_tiled = jax.block_until_ready(
        ca_layer(x, w1, b1, w2, b2, fused_slab_bytes_max=0))
    assert jnp.allclose(out_tiled, ref, atol=1e-5, rtol=1e-5), "tiled path mismatch"

    # Case 3: H*W not a multiple of 128 -> exercises in-kernel tail-lane masking
    # and Pallas-bounded edge-block writes (no jnp.pad / output slice).
    B2, C2, H2, W2 = 2, 8, 50, 50
    x2 = jax.random.normal(kx2, (B2, C2, H2, W2), dtype=jnp.float32)
    p2 = make_params(k1, k2, k3, k4, C2)
    ref2 = _ca_reference(x2, *p2)
    out2 = jax.block_until_ready(ca_layer(x2, *p2, fused_slab_bytes_max=0))
    assert jnp.allclose(out2, ref2, atol=1e-5, rtol=1e-5), "tiled(masked) mismatch"

    # Case 4: tiny block budget -> exercises row tiling (multiple row tiles) on top
    # of lane tiling + masking.
    B3, C3, H3, W3 = 4, 8, 50, 50
    x3 = jax.random.normal(kx3, (B3, C3, H3, W3), dtype=jnp.float32)
    p3 = make_params(k1, k2, k3, k4, C3)
    ref3 = _ca_reference(x3, *p3)
    out3 = jax.block_until_ready(
        ca_layer(x3, *p3, fused_slab_bytes_max=0, block_bytes_target=64 << 10))
    assert jnp.allclose(out3, ref3, atol=1e-5, rtol=1e-5), "tiled(row-tiled) mismatch"

    print("KERNEL_OK")
</pallas_src>

<mosaic_0001>
module attributes {stable_mosaic.version = 11 : i64} {
  func.func @_ca_fused_kernel(%arg0: i32, %arg1: memref<1x4x256xf32, #tpu.memory_space<vmem>>, %arg2: memref<1x4xf32, #tpu.memory_space<vmem>>, %arg3: memref<1x1xf32, #tpu.memory_space<vmem>>, %arg4: memref<4x1xf32, #tpu.memory_space<vmem>>, %arg5: memref<4x1xf32, #tpu.memory_space<vmem>>, %arg6: memref<1x4x256xf32, #tpu.memory_space<vmem>>) attributes {dimension_semantics = [#tpu.dimension_semantics<parallel>], iteration_bounds = array<i64: 2>, scalar_prefetch = 0 : i64, scratch_operands = 0 : i64, tpu.core_type = #tpu.core_type<tc>, window_params = [{transform_indices = @transform_0, window_bounds = array<i64: 1, 4, 256>}, {pipeline_mode = #tpu.pipeline_mode<synchronous>, transform_indices = @transform_1, window_bounds = array<i64: 1, 4>}, {pipeline_mode = #tpu.pipeline_mode<synchronous>, transform_indices = @transform_2, window_bounds = array<i64: 1, 1>}, {pipeline_mode = #tpu.pipeline_mode<synchronous>, transform_indices = @transform_3, window_bounds = array<i64: 4, 1>}, {pipeline_mode = #tpu.pipeline_mode<synchronous>, transform_indices = @transform_4, window_bounds = array<i64: 4, 1>}, {transform_indices = @transform_5, window_bounds = array<i64: 1, 4, 256>}]} {
    %c0 = arith.constant 0 : index
    %c0_0 = arith.constant 0 : index
    %c0_1 = arith.constant 0 : index
    %0 = vector.load %arg1[%c0, %c0_0, %c0_1] : memref<1x4x256xf32, #tpu.memory_space<vmem>>, vector<1x4x256xf32>
    %1 = vector.shape_cast %0 : vector<1x4x256xf32> to vector<4x256xf32>
    %cst = arith.constant dense<0.000000e+00> : vector<4xf32>
    %2 = vector.multi_reduction <add>, %1, %cst [1] : vector<4x256xf32> to vector<4xf32>
    %3 = vector.shape_cast %2 : vector<4xf32> to vector<4x1xf32>
    %cst_2 = arith.constant 3.906250e-03 : f32
    %4 = vector.broadcast %cst_2 : f32 to vector<4x1xf32>
    %5 = arith.mulf %3, %4 : vector<4x1xf32>
    %c0_3 = arith.constant 0 : index
    %c0_4 = arith.constant 0 : index
    %6 = vector.load %arg2[%c0_3, %c0_4] : memref<1x4xf32, #tpu.memory_space<vmem>>, vector<1x4xf32>
    %cst_5 = arith.constant dense<0.000000e+00> : vector<1x1xf32>
    %7 = tpu.matmul %6, %5, %cst_5 {dimension_numbers = #tpu.dot_dimension_numbers<[1], [0], [0], [1], [0, 0, 1, 1], [], []>} : vector<1x4xf32>, vector<4x1xf32>, vector<1x1xf32> -> vector<1x1xf32>
    %c0_6 = arith.constant 0 : index
    %c0_7 = arith.constant 0 : index
    %8 = vector.load %arg3[%c0_6, %c0_7] : memref<1x1xf32, #tpu.memory_space<vmem>>, vector<1x1xf32>
    %9 = arith.addf %7, %8 : vector<1x1xf32>
    %cst_8 = arith.constant 0.000000e+00 : f32
    %10 = vector.broadcast %cst_8 : f32 to vector<1x1xf32>
    %11 = arith.maximumf %9, %10 : vector<1x1xf32>
    %c0_9 = arith.constant 0 : index
    %c0_10 = arith.constant 0 : index
    %12 = vector.load %arg4[%c0_9, %c0_10] : memref<4x1xf32, #tpu.memory_space<vmem>>, vector<4x1xf32>
    %cst_11 = arith.constant dense<0.000000e+00> : vector<4x1xf32>
    %13 = tpu.matmul %12, %11, %cst_11 {dimension_numbers = #tpu.dot_dimension_numbers<[1], [0], [0], [1], [0, 0, 1, 1], [], []>} : vector<4x1xf32>, vector<1x1xf32>, vector<4x1xf32> -> vector<4x1xf32>
    %c0_12 = arith.constant 0 : index
    %c0_13 = arith.constant 0 : index
    %14 = vector.load %arg5[%c0_12, %c0_13] : memref<4x1xf32, #tpu.memory_space<vmem>>, vector<4x1xf32>
    %15 = arith.addf %13, %14 : vector<4x1xf32>
    %16 = arith.negf %15 : vector<4x1xf32>
    %17 = math.exp %16 : vector<4x1xf32>
    %cst_14 = arith.constant 1.000000e+00 : f32
    %18 = vector.broadcast %cst_14 : f32 to vector<4x1xf32>
    %19 = arith.addf %18, %17 : vector<4x1xf32>
    %20 = arith.divf %18, %19 : vector<4x1xf32>
    %21 = vector.broadcast %20 : vector<4x1xf32> to vector<4x256xf32>
    %22 = arith.mulf %1, %21 : vector<4x256xf32>
    %c0_15 = arith.constant 0 : index
    %c0_16 = arith.constant 0 : index
    %c0_17 = arith.constant 0 : index
    %23 = vector.load %arg6[%c0_15, %c0_16, %c0_17] : memref<1x4x256xf32, #tpu.memory_space<vmem>>, vector<1x4x256xf32>
    %24 = vector.shape_cast %23 : vector<1x4x256xf32> to vector<4x256xf32>
    %25 = vector.shape_cast %22 : vector<4x256xf32> to vector<1x4x256xf32>
    tpu.vector_store %arg6[%c0_15, %c0_16, %c0_17], %25 {strides = array<i32>} : memref<1x4x256xf32, #tpu.memory_space<vmem>>, vector<1x4x256xf32>,
    return
  }
  func.func @transform_0(%arg0: i32) -> (i32, i32, i32) {
    %c0_i32 = arith.constant 0 : i32
    %c0_i32_0 = arith.constant 0 : i32
    %c0_i32_1 = arith.constant 0 : i32
    return %arg0, %c0_i32, %c0_i32_0 : i32, i32, i32
  }
  func.func @transform_1(%arg0: i32) -> (i32, i32) {
    %c0_i32 = arith.constant 0 : i32
    %c0_i32_0 = arith.constant 0 : i32
    %c0_i32_1 = arith.constant 0 : i32
    return %c0_i32, %c0_i32_0 : i32, i32
  }
  func.func @transform_2(%arg0: i32) -> (i32, i32) {
    %c0_i32 = arith.constant 0 : i32
    %c0_i32_0 = arith.constant 0 : i32
    %c0_i32_1 = arith.constant 0 : i32
    return %c0_i32, %c0_i32_0 : i32, i32
  }
  func.func @transform_3(%arg0: i32) -> (i32, i32) {
    %c0_i32 = arith.constant 0 : i32
    %c0_i32_0 = arith.constant 0 : i32
    %c0_i32_1 = arith.constant 0 : i32
    return %c0_i32, %c0_i32_0 : i32, i32
  }
  func.func @transform_4(%arg0: i32) -> (i32, i32) {
    %c0_i32 = arith.constant 0 : i32
    %c0_i32_0 = arith.constant 0 : i32
    %c0_i32_1 = arith.constant 0 : i32
    return %c0_i32, %c0_i32_0 : i32, i32
  }
  func.func @transform_5(%arg0: i32) -> (i32, i32, i32) {
    %c0_i32 = arith.constant 0 : i32
    %c0_i32_0 = arith.constant 0 : i32
    %c0_i32_1 = arith.constant 0 : i32
    return %arg0, %c0_i32, %c0_i32_0 : i32, i32, i32
  }
}

</mosaic_0001>

<bundles_post_ra>
// kernel: tpu_custom_call.1
= control target key start
LH: loop header
LB: loop body
LE: loop exit
PB: predicated region body
PF: predicated region fallthrough
CT: control target
= control target key end

     0   :  { %s924_s0 = inlined_call_operand.hbm [shape: f32[2,4,256], index: 0, kind: input, shape index: {}]   ;;  %s925_s1 = inlined_call_operand.vmem [shape: f32[1,4], index: 1, kind: input, shape index: {}]   ;;  %s926_s2 = inlined_call_operand.<no memory space> [shape: f32[1,1], index: 2, kind: input, shape index: {}]   ;;  %s927_s3 = inlined_call_operand.vmem [shape: f32[4,1], index: 3, kind: input, shape index: {}]   ;;  %s928_s4 = inlined_call_operand.vmem [shape: f32[4,1], index: 4, kind: input, shape index: {}]   ;;  %s929_s5 = inlined_call_operand.hbm [shape: f32[2,4,256], index: 5, kind: output, shape index: {}]  }
   0x1   :  { %v10_v0 = vstv %s926_s2 }
   0x2   :  { %11 = vst [vmem:[#allocation2] sm:$0x1] %v10_v0 }
   0x3   :  { %12 = vsyncpa [#allocation4], 0 }
   0x4   :  { %14 = vsyncpa [#allocation4 + $0x1], 0 }
   0x5   :  { %15 = vsyncpa [#allocation5], 0 }
   0x6   :  { %17 = vsyncpa [#allocation5 + $0x1], 0  ;;  %s747_s20 = smov 0   ;;  %s749_s21 = smov 0  }
   0x7   :  { %s751_s22 = smov 0   ;;  %s753_s23 = smov 0  }
   0x8 LB: > { %s768_s2 = sadd.s32 4294967295, %s706_s23   ;;  %s519_s24 = sadd.s32 4294967294, %s706_s23   ;;  %s706_s23 = sphi %s753_s23, %s944_s23   ;;  %s702_s22 = sphi %s751_s22, %s943_s22   ;;  %s698_s21 = sphi %s749_s21, %s942_s21   ;;  %s694_s20 = sphi %s747_s20, %s941_s20  }
   0x9   : > { %s772_s25 = sadd.s32 1, %s706_s23   ;;  %s30_s26 = sadd.s32 1, %s702_s22 }
   0xa   : > { %s27_s27 = ssub.s32 %s706_s23, %s772_s25  ;;  %p37_p0 = scmp.ne.s32.totalorder %s702_s22, %s698_s21 }
   0xb   : > { %p28_p1 = scmp.eq.s32.totalorder %s27_s27, 0  ;;  %p38_p2 = scmp.eq.s32.totalorder %s706_s23, 0 }
   0xc   : > { %p43_p3 = scmp.ne.s32.totalorder %s698_s21, %s694_s20  ;;  %p44_p4 = scmp.eq.s32.totalorder %s768_s2, 0 }
   0xd   : > { %s784_s28 = scalar_select %p28_p1, %s702_s22, %s30_s26  }
   0xe   : > { %p786_p5 = por %p38_p2, %p37_p0  ;;  %p790_p6 = por %p44_p4, %p43_p3 }
   0xf   : > { %p151_p7 = scmp.eq.s32.totalorder %s768_s2, 1  ;;  %p157_p8 = scmp.eq.s32.totalorder %s519_s24, 1 }
  0x10   : > { %p566_p10 = scmp.lt.s32.totalorder %s706_s23, 2  ;;  %s189_s8 = sand.u32 1, %s702_s22  }
  0x11   : > { %p797_p11 = por %p151_p7, %p37_p0  ;;  %p801_p12 = por %p157_p8, %p43_p3 }
  0x12   : > { %s538_s9 = sshll.u32 %s706_s23, 7  ;;  %s522_s10 = sshll.u32 %s189_s8, 3 }
  0x13   : > { %s933_s6 = scalar_select %p797_p11, 1, 0 }
  0x14   : > { %s934_s7 = scalar_select %p801_p12, 1, 0 }
  0x15   : > { %s810_s13 = scalar_lea.hbm %s924_s0, %s538_s9  ;;  %s193_s14 = scalar_lea.vmem [#allocation3], %s522_s10 }
  0x16   : > { %s201_s15 = sshll.u32 %s193_s14, 4  ;;  %p814_p13 = pnand %p566_p10, %p786_p5  ;;  %s818_s15 = int_to_ptr.vmem [resolvable:$true] %s201_s15 }
  0x17   : > { %s190_s17 = scalar_lea.sflag [#allocation4], %s189_s8  ;;  %s610_s18 = scalar_lea.hbm %s810_s13, 128 }
  0x18   : > { %p611_p2 = scmp.ne.s32.totalorder %s810_s13, %s610_s18  ;;  %p612_p3 = pneg %p814_p13 }
  0x19   : > { %s615_s26 = scalar_lea.hbm %s924_s0, 256  ;;  %p616_p5 = scmp.lt.u32.totalorder %s810_s13, %s924_s0 }
  0x1a   : > { %p613_p4 = pnand %p612_p3, %p611_p2  ;;  %p617_p8 = scmp.lt.u32.totalorder %s615_s26, %s610_s18 }
  0x1b   : > { %p619_p9 = scmp.lt.u32.totalorder %s610_s18, %s810_s13 }
  0x1c   : > { %p614_p7 = pneg %p613_p4  ;;  %p618_p10 = por %p617_p8, %p616_p5 }
  0x1e   : > { %p620_p0 = por %p619_p9, %p618_p10 }
  0x20   : > { %p621_p1 = pnand %p620_p0, %p614_p7 }
  0x22   : > { %624 = shalt.err (!%p621_p1)
}
  0x23   : > { %s625_s8 = scalar_lea.vmem %s818_s15, 128  ;;  %s708_s9 = smov [#allocation3]  }
  0x24   : > { %p626_p2 = scmp.ne.s32.totalorder %s818_s15, %s625_s8  ;;  %s630_s10 = sshll.u32 %s708_s9, 4  ;;  %s631_s10 = int_to_ptr.vmem [resolvable:$false] %s630_s10 }
  0x25   : > { %s632_s11 = scalar_lea.vmem %s631_s10, 256  ;;  %p633_p11 = scmp.lt.s32.totalorder %s818_s15, %s631_s10 }
  0x26   : > { %p628_p4 = pnand %p626_p2, %p612_p3  ;;  %p634_p5 = scmp.lt.s32.totalorder %s632_s11, %s625_s8 }
  0x28   : > { %p629_p12 = pneg %p628_p4  ;;  %p635_p8 = por %p634_p5, %p633_p11 }
  0x2a   : > { %p636_p9 = pnand %p635_p8, %p629_p12 }
  0x2c   : > { %639 = shalt.err (!%p636_p9)
}
  0x2d   : > { %561 = dma.hbm_to_vmem [thread:$0]  (!%p814_p13), %s810_s13, 128, %s818_s15, %s190_s17  }
  0x2e   : > { %p936_p0 = scmp.lt.s32.totalorder %s706_s23, 3  ;;  %p937_p1 = scmp.ge.s32.totalorder %s706_s23, 1 }
  0x30   : > { %p207_p3 = pnand %p937_p1, %p936_p0 }
  0x31   : > { %s852_s12 = sand.u32 (!%p207_p3), 1, %s698_s21  }
  0x32   : > { %210 = sbr.rel (%p207_p3) target bundleno = 812 (0x32c), region = 40  ;;  %s526_s14 = sshll.u32 (!%p207_p3), %s852_s12, 3 }
  0x33   : > { %s213_s18 = scalar_lea.sflag (!%p207_p3), [#allocation4], %s852_s12  ;;  %s216_s16 = scalar_lea.vmem (!%p207_p3), [#allocation3], %s526_s14 }
  0x39   : > { %685 = dma.done.wait (%p790_p6), %s213_s18, 128  }
  0x3a   : > { %687 = vsyncadd (%p790_p6), %s213_s18, 4294967168  ;;  %vm247_vm0 = vcmask 1043456   ;;  %v243_v1 = vld [vmem:[%s216_s16] sm:$0xff]  ;;  %v709_v6 = vmov 0.0   ;;  %vm710_vm1 = vmmov 0   ;;  %vm256_vm2 = vcmask 31744  }
  0x3b   : > { %v245_v2 = vcombine.high %v243_v1, %v243_v1  ;;  %v248_v3 = vsel %vm247_vm0, %v243_v1, 0.0  ;;  %544 = vmatprep.subr.mxu0 %v709_v6  ;;  %549 = vmatprep.subr.mxu1 %v709_v6  ;;  %v254_v9 = vld [vmem:[%s925_s1] sm:$0x1]  ;;  %vm340_vm3 = vcmask 1040384   ;;  %vm336_vm4 = vcmask 7168   ;;  %s539_s26 = sshll.u32 %s768_s2, 7 }
  0x3c   : > { %546 = vmatprep.mubr.msk.f32.mxu0 %vm710_vm1, %v709_v6  ;;  %551 = vmatprep.mubr.msk.f32.mxu1 %vm710_vm1, %v709_v6  ;;  %v255_v10 = vld [vmem:[#allocation2] sm:$0x1]  ;;  %v711_v16 = vmov 0   ;;  %v712_v25 = vmov 839922192   ;;  %v427_v27 = vlaneseq  ;;  %s242_s27 = scalar_lea.vmem [#allocation6], %s526_s14  ;;  %s880_s10 = scalar_lea.hbm %s929_s5, %s539_s26 }
  0x3d   : > { %v249_v4 = vsel %vm247_vm0, %v245_v2, 0.0  ;;  %v334_v15 = vld [vmem:[%s927_s3] sm:$0xf]  ;;  %604 = vset.pattern.permute.xlu0 %v711_v16  ;;  %v425_v26 = vunpack.c.l.s4 %v712_v25  ;;  %s449_s29 = sshll.u32 %s242_s27, 4  ;;  %s435_s11 = scalar_lea.sflag [#allocation5], %s852_s12  ;;  %s882_s29 = int_to_ptr.vmem [resolvable:$true] %s449_s29 }
  0x3e   : > { %v250_v5 = vadd.f32 %v249_v4, %v248_v3  ;;  %v335_v17 = vld [vmem:[%s928_s4] sm:$0xf]  ;;  %v428_v29 = vshrl.u32 %v427_v27, 7  ;;  %s640_s18 = scalar_lea.vmem %s882_s29, 128  ;;  %p938_p11 = scmp.ne.s32.totalorder %s933_s6, 0 }
  0x3f   : > { %v426_v28 = vunpack.c.0.s8 %v425_v26  ;;  %p641_p6 = scmp.ne.s32.totalorder %s882_s29, %s640_s18  ;;  %s713_s2 = smov [#allocation6]  }
  0x40   : > { %251 = vadd.xlane.f32.xlu0 %v250_v5  ;;  %s644_s14 = sshll.u32 %s713_s2, 4  ;;  %s645_s14 = int_to_ptr.vmem [resolvable:$false] %s644_s14 }
  0x41   : > { %v429_v30 = vsub.s32 %v426_v28, %v428_v29  ;;  %p642_p12 = pnand %p641_p6, %p938_p11  ;;  %s646_s16 = scalar_lea.vmem %s645_s14, 256 }
  0x42   : > { %p647_p7 = scmp.lt.s32.totalorder %s882_s29, %s645_s14  ;;  %p648_p10 = scmp.lt.s32.totalorder %s646_s16, %s640_s18 }
  0x43   : > { %p643_p13 = pneg %p642_p12 }
  0x44   : > { %p649_p2 = por %p648_p10, %p647_p7 }
  0x46   : > { %p650_p4 = pnand %p649_p2, %p643_p13 }
  0xcd   : > { %v252_v7 = vpop.xlane.xlu0 %251 }
  0xce   : > { %v253_v8 = vmul.f32 0.00390625, %v252_v7 }
  0xd0   : > { %545 = vmatpush3.msk.msra.mxu0 %vm247_vm0, %v253_v8 }
  0xd1   : > { %547 = vmatmul.mubr.msk.f32.vlgmr.msra.gmra.mrb[0].mxu0 %vm256_vm2, %v254_v9 }
 0x1a4   : > { %v329_v11 = vpop.f32.mrb[0].mxu0 }
 0x1a5   : > { %v330_v12 = vadd.f32 %v329_v11, %v255_v10  ;;  %v548_v13 = vpop.f32.mrb[1].mxu0 }
 0x1a7   : > { %v333_v14 = vmax.f32 %v330_v12, 0.0 }
 0x1a9   : > { %550 = vmatpush3.msk.msra.mxu1 %vm340_vm3, %v333_v14 }
 0x1aa   : > { %552 = vmatmul.mubr.msk.f32.vlgmr.msra.gmra.mrb[0].mxu1 %vm336_vm4, %v334_v15 }
 0x27d   : > { %v410_v18 = vpop.f32.mrb[0].mxu1 }
 0x27e   : > { %v411_v19 = vadd.f32 %v410_v18, %v335_v17  ;;  %v553_v20 = vpop.f32.mrb[1].mxu1 }
 0x280   : > { %v532_v21 = vmul.f32 -1.442695, %v411_v19 }
 0x282   : > { %606 = vpow2.f32 %v532_v21 }
 0x28c   : > { %v607_v22 = vpop.eup %606 }
 0x28d   : > { %v417_v23 = vadd.f32 1.0, %v607_v22 }
 0x28f   : > { %608 = vrcp.f32 %v417_v23 }
 0x299   : > { %v609_v24 = vpop.eup %608 }
 0x29a   : > { %422 = vperm.xlu0 %604, %v609_v24  }
 0x319   : > { %v423_v31 = vpop.permute.xlu0 %422 }
 0x31a   : > { %v430_v32 = vrot.slane %v423_v31, %v429_v30 }
 0x31c   : > { %v432_v33 = vmul.f32 %v430_v32, %v243_v1 }
 0x31e   : > { %433 = vst [vmem:[%s242_s27] sm:$0xff] %v432_v33 }
 0x31f   : > { %653 = shalt.err (!%p650_p4)
}
 0x320   : > { %s654_s12 = scalar_lea.hbm %s880_s10, 128  ;;  %s658_s15 = scalar_lea.hbm %s929_s5, 256 }
 0x321   : > { %p655_p5 = scmp.ne.s32.totalorder %s880_s10, %s654_s12  ;;  %p659_p0 = scmp.lt.u32.totalorder %s880_s10, %s929_s5 }
 0x322   : > { %p660_p1 = scmp.lt.u32.totalorder %s658_s15, %s654_s12  ;;  %p662_p6 = scmp.lt.u32.totalorder %s654_s12, %s880_s10 }
 0x323   : > { %p656_p8 = pnand %p655_p5, %p938_p11 }
 0x324   : > { %p661_p3 = por %p660_p1, %p659_p0 }
 0x325   : > { %p657_p9 = pneg %p656_p8 }
 0x326   : > { %p663_p12 = por %p662_p6, %p661_p3 }
 0x328   : > { %p664_p13 = pnand %p663_p12, %p657_p9 }
 0x32a   : > { %667 = shalt.err (!%p664_p13)
}
 0x32b   : > { %556 = dma.vmem_to_hbm [thread:$0]  (%p938_p11), %s882_s29, 128, %s880_s10, %s435_s11  }
 0x32c PF: > { %s461_s24 = sand.u32 1, %s694_s20   ;;  %p939_p7 = scmp.ne.s32.totalorder %s934_s7, 0 }
 0x32d   : > { %p940_p10 = scmp.ge.s32.totalorder %s706_s23, 2  ;;  %s462_s26 = scalar_lea.sflag [#allocation5], %s461_s24 }
 0x32f   : > { %p563_p2 = pnand %p940_p10, %p939_p7 }
 0x331   : > { %689 = dma.done.wait (!%p563_p2), %s462_s26, 128  }
 0x332   : > { %691 = vsyncadd (!%p563_p2), %s462_s26, 4294967168  ;;  %p20_p4 = scmp.ge.s32.totalorder %s772_s25, 4   ;;  %s941_s20 = smov %s698_s21 }
 0x333   : > { %s942_s21 = smov %s702_s22  ;;  %s943_s22 = smov %s784_s28 }
 0x334   : > { %s944_s23 = smov %s772_s25  ;;  %22 = sbr.rel (!%p20_p4) target bundleno = 8 (0x8), region = 85 }
 0x33b   :  { %467 = vsyncpa [#allocation4], 1 }
 0x33c   :  { %469 = vsyncpa [#allocation4 + $0x1], 1 }
 0x33d   :  { %470 = vsyncpa [#allocation5], 1 }
 0x33e   :  { %472 = vsyncpa [#allocation5 + $0x1], 1 }

</bundles_post_ra>
